<compile_context>
chip_gen: v6e
topology: v6e:2x2x1
jax: 0.10.0
libtpu: 0.0.40
codegen_flags: <defaults>
</compile_context>

<pallas_src>
import functools

import numpy as np
import jax
import jax.numpy as jnp
from jax.experimental import pallas as pl
from jax.experimental.pallas import tpu as pltpu


HIDDEN = 128


def _round_up(v, m):
    return ((v + m - 1) // m) * m


def _dueling_combine_matrix(action_dim, n):
    """Constant (1 + A*n, A*n) matrix T such that

        [v | a] @ T  ==  v + a_d - mean_j(a_{d,j})   per branch d, per bin j

    T[0, :] = 1 (broadcast value); per-branch (I - 1/n) block on the diagonal
    of the advantage rows. Built from Python ints -> compile-time constant.
    """
    an = action_dim * n
    comb = np.zeros((1 + an, an), dtype=np.float32)
    comb[0, :] = 1.0
    blk = np.eye(n, dtype=np.float32) - np.full((n, n), 1.0 / n, dtype=np.float32)
    for d in range(action_dim):
        s = d * n
        comb[1 + s:1 + s + n, s:s + n] = blk
    return jnp.asarray(comb)


def _bqn_kernel(x_ref, w1_ref, b1_ref, w2_ref, b2_ref, wq_ref, bq_ref, q_ref):
    """One batch tile of the full forward pass (3 MXU matmuls).

    Ref shapes:
      x_ref  : (TB, obs)          w1_ref: (obs, 128)        b1_ref: (1, 128)
      w2_ref : (128, 128)         b2_ref: (1, 128)
      wq_ref : (128, AN_PAD)      bq_ref: (1, AN_PAD)   (heads with dueling
                                   combine already folded in, lane-padded)
      q_ref  : (TB, AN_PAD)       (lane-dense output slab)
    """
    # Trunk MLP. Dots accumulate in f32 on the MXU; bias add / ReLU stay f32
    # (v5e-friendly); activations are cast to the weight dtype before each dot
    # so a bf16 weight path uses the native bf16 MXU on v6e/v7x.
    x = x_ref[...].astype(w1_ref.dtype)
    h = jnp.dot(x, w1_ref[...], preferred_element_type=jnp.float32) + b1_ref[...]
    h = jnp.maximum(h, 0.0)
    h = jnp.dot(h.astype(w2_ref.dtype), w2_ref[...],
                preferred_element_type=jnp.float32) + b2_ref[...]
    h = jnp.maximum(h, 0.0)

    # Fused value+advantage heads with the dueling combine folded in: one matmul.
    q_ref[...] = (jnp.dot(h.astype(wq_ref.dtype), wq_ref[...],
                          preferred_element_type=jnp.float32)
                  + bq_ref[...]).astype(q_ref.dtype)


def prepare_params(params, action_dim, n_bins, *, compute_dtype=jnp.float32):
    """Fuse + fold head params once per parameter update (hoisted off the hot path).

    Returns kernel-ready arrays:
      w1 (obs,128), b1 (1,128), w2 (128,128), b2 (1,128),
      wq (128, AN_PAD), bq (1, AN_PAD)   with AN_PAD = round_up(A*n, 128)
    """
    A, n = action_dim, n_bins
    an = A * n

    # Fuse heads: W_heads = [Wv | Wa_flat], b_heads = [bv | ba_flat]   (f32).
    wa = params["wa"]                                               # (A, H, n)
    w_heads = jnp.concatenate(
        [params["wv"], jnp.transpose(wa, (1, 0, 2)).reshape(HIDDEN, an)], axis=1)
    b_heads = jnp.concatenate(
        [params["bv"].reshape(1, 1), params["ba"].reshape(1, an)], axis=1)

    # Fold the dueling combine (v + a - mean(a)) into the head weights, in f32,
    # so (h @ Wh + bh) @ T == h @ (Wh @ T) + (bh @ T).
    comb = _dueling_combine_matrix(A, n)                            # (1+an, an)
    wq = w_heads @ comb                                             # (128, an)
    bq = b_heads @ comb                                             # (1, an)

    # Lane-pad the head columns to a multiple of 128 so the kernel's output
    # store is a full-lane unmasked vst (biggest lever on v5e's single vst slot).
    an_pad = _round_up(an, 128)
    if an_pad != an:
        wq = jnp.pad(wq, ((0, 0), (0, an_pad - an)))
        bq = jnp.pad(bq, ((0, 0), (0, an_pad - an)))

    return {
        "w1": params["w1"].astype(compute_dtype),
        "b1": params["b1"],                       # biases stay f32
        "w2": params["w2"].astype(compute_dtype),
        "b2": params["b2"],
        "wq": wq.astype(compute_dtype),           # fold in f32, cast once after
        "bq": bq,
    }


def branching_q_forward(x, prepped, action_dim, n_bins, *, block_b=128):
    """Pallas forward. x: (B, obs) f32, prepped from prepare_params().
    Returns (B, action_dim, n_bins) f32."""
    B, obs = x.shape
    A, n = action_dim, n_bins
    an = A * n
    an_pad = prepped["wq"].shape[1]

    # Batch tiling: TB multiple of 8 (sublanes), <= block_b (128 default keeps
    # live activations well under the vreg budget). When B >= 16 also cap at
    # ceil(B/2) so there are >= 2 grid blocks and both v7x TCs participate.
    TB = _round_up(B, 8)
    if B >= 16:
        TB = min(TB, _round_up((B + 1) // 2, 8))
    TB = min(TB, block_b)
    B_pad = _round_up(B, TB)
    x_p = jnp.pad(x, ((0, B_pad - B), (0, 0))) if B_pad != B else x
    num_blocks = B_pad // TB

    const = lambda i: (0, 0)   # weights: same block every step -> resident in VMEM
    # (pipeline_mode=pl.Buffered(1) on constant-index operands would trim a bit
    #  of pipeline bookkeeping; skipped as low-priority.)

    q_pad = pl.pallas_call(
        _bqn_kernel,
        out_shape=jax.ShapeDtypeStruct((B_pad, an_pad), jnp.float32),
        grid=(num_blocks,),
        in_specs=[
            pl.BlockSpec((TB, obs), lambda i: (i, 0)),
            pl.BlockSpec(prepped["w1"].shape, const),
            pl.BlockSpec(prepped["b1"].shape, const),
            pl.BlockSpec(prepped["w2"].shape, const),
            pl.BlockSpec(prepped["b2"].shape, const),
            pl.BlockSpec(prepped["wq"].shape, const),
            pl.BlockSpec(prepped["bq"].shape, const),
        ],
        out_specs=pl.BlockSpec((TB, an_pad), lambda i: (i, 0)),
        compiler_params=pltpu.CompilerParams(
            dimension_semantics=("parallel",)),   # v7x: 2 TCs split the batch
    )(x_p, prepped["w1"], prepped["b1"], prepped["w2"], prepped["b2"],
      prepped["wq"], prepped["bq"])

    # Slice off batch padding + lane padding; free contiguous reshape to (B, A, n).
    return q_pad[:B, :an].reshape(B, A, n)


def init_params(key, obs_size, action_dim, n_bins):
    """Deterministic init mimicking nn.Linear default U(-1/sqrt(fan_in), 1/sqrt(fan_in))."""
    ks = jax.random.split(key, 10)

    def uni(k, shape, fan_in):
        bound = 1.0 / jnp.sqrt(jnp.float32(fan_in))
        return jax.random.uniform(k, shape, jnp.float32, -bound, bound)

    return {
        "w1": uni(ks[0], (obs_size, HIDDEN), obs_size),
        "b1": uni(ks[1], (1, HIDDEN), obs_size),
        "w2": uni(ks[2], (HIDDEN, HIDDEN), HIDDEN),
        "b2": uni(ks[3], (1, HIDDEN), HIDDEN),
        "wv": uni(ks[4], (HIDDEN, 1), HIDDEN),
        "bv": uni(ks[5], (1, 1), HIDDEN),
        "wa": uni(ks[6], (action_dim, HIDDEN, n_bins), HIDDEN),
        "ba": uni(ks[7], (action_dim, 1, n_bins), HIDDEN),
    }


def reference_forward(x, params):
    """Pure-JAX reference of the PyTorch forward."""
    h = jnp.maximum(x @ params["w1"] + params["b1"], 0.0)
    h = jnp.maximum(h @ params["w2"] + params["b2"], 0.0)
    value = h @ params["wv"] + params["bv"]                                     # (B, 1)
    advs = jnp.einsum("bh,ahn->ban", h, params["wa"]) + params["ba"][:, 0, :][None]
    q = value[:, :, None] + advs - advs.mean(axis=2, keepdims=True)
    return q


if __name__ == "__main__":
    # LunarLander-continuous style sizes: obs=8, action_dim=2 branches, n=6 bins.
    OBS, ACTION_DIM, N_BINS, BATCH = 8, 2, 6, 4

    key = jax.random.PRNGKey(0)
    pkey, xkey = jax.random.split(key)
    params = init_params(pkey, OBS, ACTION_DIM, N_BINS)
    x = jax.random.normal(xkey, (BATCH, OBS), jnp.float32)

    fwd = jax.jit(functools.partial(branching_q_forward,
                                    action_dim=ACTION_DIM, n_bins=N_BINS))

    # f32 path (default): exact parity with the PyTorch module.
    prepped_f32 = prepare_params(params, ACTION_DIM, N_BINS,
                                 compute_dtype=jnp.float32)
    q = fwd(x, prepped_f32)
    jax.block_until_ready(q)

    q_ref = reference_forward(x, params)
    assert q.shape == (BATCH, ACTION_DIM, N_BINS), q.shape
    assert jnp.allclose(q, q_ref, atol=1e-5, rtol=1e-5), "f32 mismatch vs reference"

    # Larger batch exercises padding + the >=2-block (megacore) path.
    x_big = jax.random.normal(jax.random.PRNGKey(1), (37, OBS), jnp.float32)
    q_big = fwd(x_big, prepped_f32)
    jax.block_until_ready(q_big)
    assert jnp.allclose(q_big, reference_forward(x_big, params),
                        atol=1e-5, rtol=1e-5), "f32 (batched) mismatch vs reference"

    # bf16 compute path (v6e/v7x fast MXU path); looser tolerance.
    prepped_bf16 = prepare_params(params, ACTION_DIM, N_BINS,
                                  compute_dtype=jnp.bfloat16)
    q_bf16 = fwd(x, prepped_bf16)
    jax.block_until_ready(q_bf16)
    assert jnp.allclose(q_bf16, q_ref, atol=5e-2, rtol=5e-2), "bf16 mismatch vs reference"

    print("KERNEL_OK")
</pallas_src>

<mosaic_0001>
module attributes {stable_mosaic.version = 11 : i64} {
  func.func @_bqn_kernel(%arg0: i32, %arg1: memref<8x8xf32, #tpu.memory_space<vmem>>, %arg2: memref<8x128xf32, #tpu.memory_space<vmem>>, %arg3: memref<1x128xf32, #tpu.memory_space<vmem>>, %arg4: memref<128x128xf32, #tpu.memory_space<vmem>>, %arg5: memref<1x128xf32, #tpu.memory_space<vmem>>, %arg6: memref<128x128xf32, #tpu.memory_space<vmem>>, %arg7: memref<1x128xf32, #tpu.memory_space<vmem>>, %arg8: memref<8x128xf32, #tpu.memory_space<vmem>>) attributes {dimension_semantics = [#tpu.dimension_semantics<parallel>], iteration_bounds = array<i64: 1>, scalar_prefetch = 0 : i64, scratch_operands = 0 : i64, tpu.core_type = #tpu.core_type<tc>, window_params = [{transform_indices = @transform_0, window_bounds = array<i64: 8, 8>}, {pipeline_mode = #tpu.pipeline_mode<synchronous>, transform_indices = @transform_1, window_bounds = array<i64: 8, 128>}, {pipeline_mode = #tpu.pipeline_mode<synchronous>, transform_indices = @transform_2, window_bounds = array<i64: 1, 128>}, {pipeline_mode = #tpu.pipeline_mode<synchronous>, transform_indices = @transform_3, window_bounds = array<i64: 128, 128>}, {pipeline_mode = #tpu.pipeline_mode<synchronous>, transform_indices = @transform_4, window_bounds = array<i64: 1, 128>}, {pipeline_mode = #tpu.pipeline_mode<synchronous>, transform_indices = @transform_5, window_bounds = array<i64: 128, 128>}, {pipeline_mode = #tpu.pipeline_mode<synchronous>, transform_indices = @transform_6, window_bounds = array<i64: 1, 128>}, {transform_indices = @transform_7, window_bounds = array<i64: 8, 128>}]} {
    %c0 = arith.constant 0 : index
    %c0_0 = arith.constant 0 : index
    %0 = vector.load %arg1[%c0, %c0_0] : memref<8x8xf32, #tpu.memory_space<vmem>>, vector<8x8xf32>
    %c0_1 = arith.constant 0 : index
    %c0_2 = arith.constant 0 : index
    %1 = vector.load %arg2[%c0_1, %c0_2] : memref<8x128xf32, #tpu.memory_space<vmem>>, vector<8x128xf32>
    %cst = arith.constant dense<0.000000e+00> : vector<8x128xf32>
    %2 = tpu.matmul %0, %1, %cst {dimension_numbers = #tpu.dot_dimension_numbers<[1], [0], [0], [1], [0, 0, 1, 1], [], []>} : vector<8x8xf32>, vector<8x128xf32>, vector<8x128xf32> -> vector<8x128xf32>
    %c0_3 = arith.constant 0 : index
    %c0_4 = arith.constant 0 : index
    %3 = vector.load %arg3[%c0_3, %c0_4] : memref<1x128xf32, #tpu.memory_space<vmem>>, vector<1x128xf32>
    %4 = vector.broadcast %3 : vector<1x128xf32> to vector<8x128xf32>
    %5 = arith.addf %2, %4 : vector<8x128xf32>
    %cst_5 = arith.constant 0.000000e+00 : f32
    %6 = vector.broadcast %cst_5 : f32 to vector<8x128xf32>
    %7 = arith.maximumf %5, %6 : vector<8x128xf32>
    %c0_6 = arith.constant 0 : index
    %c0_7 = arith.constant 0 : index
    %8 = vector.load %arg4[%c0_6, %c0_7] : memref<128x128xf32, #tpu.memory_space<vmem>>, vector<128x128xf32>
    %cst_8 = arith.constant dense<0.000000e+00> : vector<8x128xf32>
    %9 = tpu.matmul %7, %8, %cst_8 {dimension_numbers = #tpu.dot_dimension_numbers<[1], [0], [0], [1], [0, 0, 1, 1], [], []>} : vector<8x128xf32>, vector<128x128xf32>, vector<8x128xf32> -> vector<8x128xf32>
    %c0_9 = arith.constant 0 : index
    %c0_10 = arith.constant 0 : index
    %10 = vector.load %arg5[%c0_9, %c0_10] : memref<1x128xf32, #tpu.memory_space<vmem>>, vector<1x128xf32>
    %11 = vector.broadcast %10 : vector<1x128xf32> to vector<8x128xf32>
    %12 = arith.addf %9, %11 : vector<8x128xf32>
    %cst_11 = arith.constant 0.000000e+00 : f32
    %13 = vector.broadcast %cst_11 : f32 to vector<8x128xf32>
    %14 = arith.maximumf %12, %13 : vector<8x128xf32>
    %c0_12 = arith.constant 0 : index
    %c0_13 = arith.constant 0 : index
    %15 = vector.load %arg6[%c0_12, %c0_13] : memref<128x128xf32, #tpu.memory_space<vmem>>, vector<128x128xf32>
    %cst_14 = arith.constant dense<0.000000e+00> : vector<8x128xf32>
    %16 = tpu.matmul %14, %15, %cst_14 {dimension_numbers = #tpu.dot_dimension_numbers<[1], [0], [0], [1], [0, 0, 1, 1], [], []>} : vector<8x128xf32>, vector<128x128xf32>, vector<8x128xf32> -> vector<8x128xf32>
    %c0_15 = arith.constant 0 : index
    %c0_16 = arith.constant 0 : index
    %17 = vector.load %arg7[%c0_15, %c0_16] : memref<1x128xf32, #tpu.memory_space<vmem>>, vector<1x128xf32>
    %18 = vector.broadcast %17 : vector<1x128xf32> to vector<8x128xf32>
    %19 = arith.addf %16, %18 : vector<8x128xf32>
    %c0_17 = arith.constant 0 : index
    %c0_18 = arith.constant 0 : index
    %20 = vector.load %arg8[%c0_17, %c0_18] : memref<8x128xf32, #tpu.memory_space<vmem>>, vector<8x128xf32>
    tpu.vector_store %arg8[%c0_17, %c0_18], %19 {strides = array<i32>} : memref<8x128xf32, #tpu.memory_space<vmem>>, vector<8x128xf32>,
    return
  }
  func.func @transform_0(%arg0: i32) -> (i32, i32) {
    %c0_i32 = arith.constant 0 : i32
    %c0_i32_0 = arith.constant 0 : i32
    return %arg0, %c0_i32 : i32, i32
  }
  func.func @transform_1(%arg0: i32) -> (i32, i32) {
    %c0_i32 = arith.constant 0 : i32
    %c0_i32_0 = arith.constant 0 : i32
    %c0_i32_1 = arith.constant 0 : i32
    return %c0_i32, %c0_i32_0 : i32, i32
  }
  func.func @transform_2(%arg0: i32) -> (i32, i32) {
    %c0_i32 = arith.constant 0 : i32
    %c0_i32_0 = arith.constant 0 : i32
    %c0_i32_1 = arith.constant 0 : i32
    return %c0_i32, %c0_i32_0 : i32, i32
  }
  func.func @transform_3(%arg0: i32) -> (i32, i32) {
    %c0_i32 = arith.constant 0 : i32
    %c0_i32_0 = arith.constant 0 : i32
    %c0_i32_1 = arith.constant 0 : i32
    return %c0_i32, %c0_i32_0 : i32, i32
  }
  func.func @transform_4(%arg0: i32) -> (i32, i32) {
    %c0_i32 = arith.constant 0 : i32
    %c0_i32_0 = arith.constant 0 : i32
    %c0_i32_1 = arith.constant 0 : i32
    return %c0_i32, %c0_i32_0 : i32, i32
  }
  func.func @transform_5(%arg0: i32) -> (i32, i32) {
    %c0_i32 = arith.constant 0 : i32
    %c0_i32_0 = arith.constant 0 : i32
    %c0_i32_1 = arith.constant 0 : i32
    return %c0_i32, %c0_i32_0 : i32, i32
  }
  func.func @transform_6(%arg0: i32) -> (i32, i32) {
    %c0_i32 = arith.constant 0 : i32
    %c0_i32_0 = arith.constant 0 : i32
    %c0_i32_1 = arith.constant 0 : i32
    return %c0_i32, %c0_i32_0 : i32, i32
  }
  func.func @transform_7(%arg0: i32) -> (i32, i32) {
    %c0_i32 = arith.constant 0 : i32
    %c0_i32_0 = arith.constant 0 : i32
    return %arg0, %c0_i32 : i32, i32
  }
}

</mosaic_0001>

<bundles_post_ra>
// kernel: branching_q_forward.1
= control target key start
LH: loop header
LB: loop body
LE: loop exit
PB: predicated region body
PF: predicated region fallthrough
CT: control target
= control target key end

     0   :  { %12 = vsyncpa [#allocation3], 0  ;;  %s606_s0 = inlined_call_operand.vmem [shape: f32[8,8], index: 0, kind: input, shape index: {}]   ;;  %s607_s1 = inlined_call_operand.vmem [shape: f32[8,128], index: 1, kind: input, shape index: {}]   ;;  %s608_s2 = inlined_call_operand.vmem [shape: f32[1,128], index: 2, kind: input, shape index: {}]   ;;  %s609_s3 = inlined_call_operand.hbm [shape: f32[128,128], index: 3, kind: input, shape index: {}]   ;;  %s610_s4 = inlined_call_operand.vmem [shape: f32[1,128], index: 4, kind: input, shape index: {}]   ;;  %s611_s5 = inlined_call_operand.hbm [shape: f32[128,128], index: 5, kind: input, shape index: {}]   ;;  %s612_s6 = inlined_call_operand.vmem [shape: f32[1,128], index: 6, kind: input, shape index: {}]   ;;  %s613_s7 = inlined_call_operand.vmem [shape: f32[8,128], index: 7, kind: output, shape index: {}]  }
   0x1   :  { %13 = vsyncpa [#allocation5], 0  ;;  %s497_s24 = smov [#allocation2]  }
   0x2   :  { %s25_s25 = sshll.u32 %s497_s24, 4  ;;  %s26_s25 = int_to_ptr.vmem [resolvable:$true] %s25_s25 }
   0x3   :  { %s461_s26 = scalar_lea.vmem %s26_s25, 2048  ;;  %p466_p1 = scmp.lt.s32.totalorder %s26_s25, %s26_s25 }
   0x4   :  { %p462_p0 = scmp.ne.s32.totalorder %s26_s25, %s461_s26  ;;  %p467_p2 = scmp.lt.s32.totalorder %s461_s26, %s461_s26 }
   0x6   :  { %p468_p3 = por %p467_p2, %p466_p1 }
   0x8   :  { %p469_p4 = pnand %p468_p3, %p462_p0 }
   0xa   :  { %472 = shalt.err (!%p469_p4)
}
   0xb   :  { %s498_s27 = smov 128   ;;  %s499_s28 = smov 8  }
   0xc   :  { %31 = dma.hbm_to_vmem [thread:$0]  %s609_s3, 2048, %s26_s25, [#allocation3], %s498_s27, %s498_s27, %s499_s28  }
   0xd   :  { %s500_s8 = smov [#allocation4]  }
   0xe   :  { %s39_s9 = sshll.u32 %s500_s8, 4  ;;  %s40_s9 = int_to_ptr.vmem [resolvable:$true] %s39_s9 }
   0xf   :  { %s481_s10 = scalar_lea.vmem %s40_s9, 2048  ;;  %p486_p6 = scmp.lt.s32.totalorder %s40_s9, %s40_s9 }
  0x10   :  { %p482_p5 = scmp.ne.s32.totalorder %s40_s9, %s481_s10  ;;  %p487_p7 = scmp.lt.s32.totalorder %s481_s10, %s481_s10 }
  0x12   :  { %p488_p8 = por %p487_p7, %p486_p6 }
  0x14   :  { %p489_p9 = pnand %p488_p8, %p482_p5 }
  0x16   :  { %492 = shalt.err (!%p489_p9)
}
  0x17   :  { %45 = dma.hbm_to_vmem [thread:$0]  %s611_s5, 2048, %s40_s9, [#allocation5], %s498_s27, %s498_s27, %s499_s28  }
  0x18   :  { %493 = dma.done.wait [#allocation3], 2048  }
  0x19   :  { %494 = vsyncadd [#allocation3], 4294965248 }
  0x1a   :  { %495 = dma.done.wait [#allocation5], 2048  }
  0x1b   :  { %496 = vsyncadd [#allocation5], 4294965248  ;;  %v501_v0 = vmov 0.0   ;;  %vm502_vm0 = vmmov 0   ;;  %vm63_vm1 = vcmask 64512   ;;  %v55_v1 = vld [vmem:[%s607_s1] sm:$0xff] }
  0x1c   :  { %372 = vmatprep.subr.mxu0 %v501_v0  ;;  %374 = vmatprep.mubr.msk.f32.mxu0 %vm502_vm0, %v501_v0  ;;  %v54_v2 = vld [vmem:[%s606_s0] sm:$0xff]  ;;  %v153_v3 = vld [vmem:[#allocation2 + $0x78] sm:$0xff]  ;;  %v152_v4 = vld [vmem:[#allocation2 + $0x70] sm:$0xff] }
  0x1d   :  { %377 = vmatprep.subr.mxu1 %v501_v0  ;;  %409 = vmatprep.mubr.msk.f32.mxu1 %vm502_vm0, %v501_v0  ;;  %v151_v5 = vld [vmem:[#allocation2 + $0x68] sm:$0xff]  ;;  %v150_v6 = vld [vmem:[#allocation2 + $0x60] sm:$0xff]  ;;  %v149_v7 = vld [vmem:[#allocation2 + $0x58] sm:$0xff] }
  0x1e   :  { %373 = vmatpush3.msra.mxu0 %v55_v1  ;;  %378 = vmatpush3.msra.mxu1 %v153_v3  ;;  %v148_v8 = vld [vmem:[#allocation2 + $0x50] sm:$0xff]  ;;  %v147_v9 = vld [vmem:[#allocation2 + $0x48] sm:$0xff]  ;;  %v146_v10 = vld [vmem:[#allocation2 + $0x40] sm:$0xff] }
  0x1f   :  { %375 = vmatmul.mubr.msk.f32.vlgmr.msra.gmra.mxu0 %vm63_vm1, %v54_v2  ;;  %379 = vmatprep.subr.mxu1 %v501_v0  ;;  %v145_v11 = vld [vmem:[#allocation2 + $0x38] sm:$0xff]  ;;  %v144_v12 = vld [vmem:[#allocation2 + $0x30] sm:$0xff]  ;;  %v143_v13 = vld [vmem:[#allocation2 + $0x28] sm:$0xff] }
  0x20   :  { %380 = vmatpush3.msra.mxu1 %v152_v4  ;;  %412 = vmatprep.subr.mxu0 %v501_v0  ;;  %v142_v14 = vld [vmem:[#allocation2 + $0x20] sm:$0xff]  ;;  %v141_v15 = vld [vmem:[#allocation2 + $0x18] sm:$0xff]  ;;  %v140_v16 = vld [vmem:[#allocation2 + $0x10] sm:$0xff] }
  0x21   :  { %381 = vmatprep.subr.mxu1 %v501_v0  ;;  %444 = vmatprep.mubr.msk.f32.mxu0 %vm502_vm0, %v501_v0  ;;  %v139_v17 = vld [vmem:[#allocation2 + $0x8] sm:$0xff]  ;;  %v138_v18 = vld [vmem:[#allocation2] sm:$0xff]  ;;  %v247_v19 = vld [vmem:[#allocation4 + $0x78] sm:$0xff] }
  0x22   :  { %382 = vmatpush3.msra.mxu1 %v151_v5  ;;  %v246_v20 = vld [vmem:[#allocation4 + $0x70] sm:$0xff]  ;;  %413 = vmatpush3.msra.mxu0 %v247_v19  ;;  %v245_v21 = vld [vmem:[#allocation4 + $0x68] sm:$0xff]  ;;  %v244_v22 = vld [vmem:[#allocation4 + $0x60] sm:$0xff] }
  0x23   :  { %383 = vmatprep.subr.mxu1 %v501_v0  ;;  %414 = vmatprep.subr.mxu0 %v501_v0  ;;  %v243_v23 = vld [vmem:[#allocation4 + $0x58] sm:$0xff]  ;;  %v242_v24 = vld [vmem:[#allocation4 + $0x50] sm:$0xff]  ;;  %v241_v25 = vld [vmem:[#allocation4 + $0x48] sm:$0xff] }
  0x24   :  { %384 = vmatpush3.msra.mxu1 %v150_v6  ;;  %415 = vmatpush3.msra.mxu0 %v246_v20  ;;  %v240_v26 = vld [vmem:[#allocation4 + $0x40] sm:$0xff]  ;;  %v239_v27 = vld [vmem:[#allocation4 + $0x38] sm:$0xff]  ;;  %v238_v28 = vld [vmem:[#allocation4 + $0x30] sm:$0xff] }
  0x25   :  { %385 = vmatprep.subr.mxu1 %v501_v0  ;;  %416 = vmatprep.subr.mxu0 %v501_v0  ;;  %v237_v29 = vld [vmem:[#allocation4 + $0x28] sm:$0xff]  ;;  %v236_v30 = vld [vmem:[#allocation4 + $0x20] sm:$0xff]  ;;  %v235_v31 = vld [vmem:[#allocation4 + $0x18] sm:$0xff] }
  0x26   :  { %386 = vmatpush3.msra.mxu1 %v149_v7  ;;  %417 = vmatpush3.msra.mxu0 %v245_v21  ;;  %v332_v32 = vld [vmem:[%s608_s2] ss:$0 sm:$0xff]  ;;  %v234_v37 = vld [vmem:[#allocation4 + $0x10] sm:$0xff]  ;;  %v233_v38 = vld [vmem:[#allocation4 + $0x8] sm:$0xff] }
  0x27   :  { %387 = vmatprep.subr.mxu1 %v501_v0  ;;  %418 = vmatprep.subr.mxu0 %v501_v0  ;;  %v232_v39 = vld [vmem:[#allocation4] sm:$0xff] }
  0x28   :  { %388 = vmatpush3.msra.mxu1 %v148_v8  ;;  %419 = vmatpush3.msra.mxu0 %v244_v22  ;;  %v334_v40 = vld [vmem:[%s610_s4] ss:$0 sm:$0xff] }
  0x29   :  { %389 = vmatprep.subr.mxu1 %v501_v0  ;;  %420 = vmatprep.subr.mxu0 %v501_v0  ;;  %v335_v45 = vld [vmem:[%s612_s6] ss:$0 sm:$0xff] }
  0x2a   :  { %390 = vmatpush3.msra.mxu1 %v147_v9  ;;  %421 = vmatpush3.msra.mxu0 %v243_v23 }
  0x2b   :  { %391 = vmatprep.subr.mxu1 %v501_v0  ;;  %422 = vmatprep.subr.mxu0 %v501_v0 }
  0x2c   :  { %392 = vmatpush3.msra.mxu1 %v146_v10  ;;  %423 = vmatpush3.msra.mxu0 %v242_v24 }
  0x2d   :  { %393 = vmatprep.subr.mxu1 %v501_v0  ;;  %424 = vmatprep.subr.mxu0 %v501_v0 }
  0x2e   :  { %394 = vmatpush3.msra.mxu1 %v145_v11  ;;  %425 = vmatpush3.msra.mxu0 %v241_v25 }
  0x2f   :  { %395 = vmatprep.subr.mxu1 %v501_v0  ;;  %426 = vmatprep.subr.mxu0 %v501_v0 }
  0x30   :  { %396 = vmatpush3.msra.mxu1 %v144_v12  ;;  %427 = vmatpush3.msra.mxu0 %v240_v26 }
  0x31   :  { %397 = vmatprep.subr.mxu1 %v501_v0  ;;  %428 = vmatprep.subr.mxu0 %v501_v0 }
  0x32   :  { %398 = vmatpush3.msra.mxu1 %v143_v13  ;;  %429 = vmatpush3.msra.mxu0 %v239_v27 }
  0x33   :  { %399 = vmatprep.subr.mxu1 %v501_v0  ;;  %430 = vmatprep.subr.mxu0 %v501_v0 }
  0x34   :  { %400 = vmatpush3.msra.mxu1 %v142_v14  ;;  %431 = vmatpush3.msra.mxu0 %v238_v28 }
  0x35   :  { %401 = vmatprep.subr.mxu1 %v501_v0  ;;  %432 = vmatprep.subr.mxu0 %v501_v0 }
  0x36   :  { %402 = vmatpush3.msra.mxu1 %v141_v15  ;;  %433 = vmatpush3.msra.mxu0 %v237_v29 }
  0x37   :  { %403 = vmatprep.subr.mxu1 %v501_v0  ;;  %434 = vmatprep.subr.mxu0 %v501_v0 }
  0x38   :  { %404 = vmatpush3.msra.mxu1 %v140_v16  ;;  %435 = vmatpush3.msra.mxu0 %v236_v30 }
  0x39   :  { %405 = vmatprep.subr.mxu1 %v501_v0  ;;  %436 = vmatprep.subr.mxu0 %v501_v0 }
  0x3a   :  { %406 = vmatpush3.msra.mxu1 %v139_v17  ;;  %437 = vmatpush3.msra.mxu0 %v235_v31 }
  0x3b   :  { %407 = vmatprep.subr.mxu1 %v501_v0  ;;  %438 = vmatprep.subr.mxu0 %v501_v0 }
  0x3c   :  { %408 = vmatpush3.msra.mxu1 %v138_v18  ;;  %439 = vmatpush3.msra.mxu0 %v234_v37 }
  0x3d   :  { %440 = vmatprep.subr.mxu0 %v501_v0 }
  0x3e   :  { %441 = vmatpush3.msra.mxu0 %v233_v38 }
  0x3f   :  { %442 = vmatprep.subr.mxu0 %v501_v0 }
  0x40   :  { %443 = vmatpush3.msra.mxu0 %v232_v39 }
  0xdf   :  { %v133_v33 = vpop.f32.mrf.mxu0 }
  0xe0   :  { %v134_v34 = vadd.f32 %v332_v32, %v133_v33 }
  0xe1   :  { %v376_v35 = vpop.f32.mrf.mxu0 }
  0xe2   :  { %v137_v36 = vmax.f32 %v134_v34, 0.0 }
  0xe4   :  { %410 = vmatmul.mubr.f32.vlgmr.msra.gmra.mxu1 %v137_v36 }
 0x1a4   :  { %v227_v41 = vpop.f32.mrf.mxu1 }
 0x1a5   :  { %v228_v42 = vadd.f32 %v334_v40, %v227_v41 }
 0x1a6   :  { %v411_v43 = vpop.f32.mrf.mxu1 }
 0x1a7   :  { %v231_v44 = vmax.f32 %v228_v42, 0.0 }
 0x1a9   :  { %445 = vmatmul.mubr.f32.vlgmr.msra.gmra.mxu0 %v231_v44 }
 0x269   :  { %v321_v46 = vpop.f32.mrf.mxu0 }
 0x26a   :  { %v322_v47 = vadd.f32 %v335_v45, %v321_v46 }
 0x26b   :  { %v446_v48 = vpop.f32.mrf.mxu0 }
 0x26c   :  { %325 = vst [vmem:[%s613_s7] sm:$0xff] %v322_v47 }
 0x26d   :  { %330 = vsyncpa [#allocation3], 1 }
 0x26e   :  { %331 = vsyncpa [#allocation5], 1 }

</bundles_post_ra>
